<compile_context>
chip_gen: v5e
topology: v5e:2x2
jax: 0.10.0
libtpu: 0.0.40
codegen_flags: <defaults>
</compile_context>

<pallas_src>
import math

import jax
import jax.numpy as jnp
from jax.experimental import pallas as pl
from jax.experimental.pallas import tpu as pltpu


def _round_up(x, m):
    return (x + m - 1) // m * m


def _device_kind():
    try:
        return jax.devices()[0].device_kind.lower()
    except Exception:
        return ""


def _vmem_capacity_bytes():
    try:
        return int(pltpu.get_tpu_info().vmem_capacity_bytes)
    except Exception:
        return (64 << 20) if "v7" in _device_kind() else (128 << 20)


def _try_single_buffer(call):
    """Prefer pipeline_mode=pl.Buffered(1) on grid/batch-constant operands; fall back
    to default double-buffered specs if the runtime rejects single buffering."""
    try:
        return call(True)
    except Exception:
        return call(False)


# --------------------------------------------------------------------------- kernels


def _gcn_fused_kernel(ops_ref, adj_ref, wt_ref, b_ref, out_ref):
    """One batch element per grid step (grid=(B,), batch dim squeezed).
    ops (N,Fi) raw dtype, adj (N,N) raw dtype, wt (Fi,Fo_p) compute, b (1,Fo_p) f32."""
    cd = wt_ref.dtype
    support = jnp.dot(ops_ref[...].astype(cd), wt_ref[...],
                      preferred_element_type=jnp.float32)
    acc = jnp.dot(adj_ref[...].astype(cd), support.astype(cd),
                  preferred_element_type=jnp.float32)
    out_ref[...] = (jnp.maximum(acc, 0.0) + b_ref[...]).astype(out_ref.dtype)


def _gcn_tiled_kernel(ops_ref, adj_ref, wt_ref, b_ref, out_ref, support_ref):
    """grid=(B, N/TM).  support for the current batch element is computed once
    (j == 0) into VMEM scratch; adjacency is the only operand streamed per row tile
    and is cast to the compute dtype in-register after the DMA."""
    cd = support_ref.dtype

    @pl.when(pl.program_id(1) == 0)
    def _():
        support_ref[...] = jnp.dot(
            ops_ref[...].astype(cd), wt_ref[...],
            preferred_element_type=jnp.float32).astype(cd)

    acc = jnp.dot(adj_ref[...].astype(cd), support_ref[...],
                  preferred_element_type=jnp.float32)
    out_ref[...] = (jnp.maximum(acc, 0.0) + b_ref[...]).astype(out_ref.dtype)


def _gcn_rows_kernel(support_ref, adj_ref, b_ref, out_ref):
    """Decoupled variant: support precomputed outside -> row tiles are independent and
    the (B, N/TM) grid is fully 'parallel' (keeps both v7x TensorCores busy at B=1)."""
    acc = jnp.dot(adj_ref[...].astype(support_ref.dtype), support_ref[...],
                  preferred_element_type=jnp.float32)
    out_ref[...] = (jnp.maximum(acc, 0.0) + b_ref[...]).astype(out_ref.dtype)


# --------------------------------------------------------------------------- wrapper


def graph_convolution(ops, adj, weight, bias=None, *, tm=None,
                      compute_dtype=jnp.bfloat16, force_tiled=False,
                      decouple_support=None):
    """ops: [B, N, F_in], adj: [B, N, N], weight: [F_out, F_in], bias: [F_out] | None."""
    B, N, F_in = ops.shape
    F_out = weight.shape[0]
    out_dtype = ops.dtype

    kind = _device_kind()
    vmem_cap = _vmem_capacity_bytes()
    if tm is None:
        # v6e: 256x256 MXU + 128 MiB VMEM -> bigger row tiles; v5e/v7x -> 128.
        tm = 256 if "v6" in kind else 128

    F_out_p = _round_up(F_out, 128)            # lane-dense output / weight columns
    csz = jnp.dtype(compute_dtype).itemsize
    osz = jnp.dtype(out_dtype).itemsize
    isz_ops = jnp.dtype(ops.dtype).itemsize
    isz_adj = jnp.dtype(adj.dtype).itemsize

    # One-time prep of the tiny reusable operands only (pre-transposed weight + bias).
    wt = jnp.zeros((F_in, F_out_p), compute_dtype)
    wt = wt.at[:, :F_out].set(weight.T.astype(compute_dtype))
    b2 = jnp.zeros((1, F_out_p), jnp.float32)
    if bias is not None:
        b2 = b2.at[0, :F_out].set(bias.astype(jnp.float32))

    flops = 2 * B * N * F_in * F_out + 2 * B * N * N * F_out
    bytes_accessed = (B * N * F_in * isz_ops + B * N * N * isz_adj
                      + F_in * F_out_p * csz + F_out_p * 4
                      + B * N * F_out_p * osz)
    cost = pl.CostEstimate(flops=int(flops), transcendentals=0,
                           bytes_accessed=int(bytes_accessed))

    budget = vmem_cap * 5 // 8                 # <= ~40 MiB on v7x, ~80 MiB on v5e/v6e

    def _limit(foot):
        lim = int(min(max(foot + foot // 2 + (2 << 20), 32 << 20), budget))
        lim = max(lim, int(foot) + (2 << 20))
        return int(min(lim, vmem_cap - (4 << 20)))

    # ---------------- fused (whole graph per grid step) vs. row-tiled decision ------
    fused_foot = (2 * (N * F_in * isz_ops + N * N * isz_adj + N * F_out_p * osz)
                  + F_in * F_out_p * csz + F_out_p * 4
                  + 2 * N * F_out_p * 4)        # live f32 support / accumulator
    fused_budget = vmem_cap // 8                # ~8 MiB on v7x, ~16 MiB on v5e/v6e
    use_fused = (not force_tiled) and fused_foot <= fused_budget

    if use_fused:
        def call(single_buffer):
            def cspec(shape, imap):
                if single_buffer:
                    return pl.BlockSpec(shape, imap, pipeline_mode=pl.Buffered(1))
                return pl.BlockSpec(shape, imap)

            return pl.pallas_call(
                _gcn_fused_kernel,
                out_shape=jax.ShapeDtypeStruct((B, N, F_out_p), out_dtype),
                grid_spec=pltpu.PrefetchScalarGridSpec(
                    num_scalar_prefetch=0,
                    grid=(B,),
                    in_specs=[
                        pl.BlockSpec((pl.Squeezed(), N, F_in), lambda b: (b, 0, 0)),
                        pl.BlockSpec((pl.Squeezed(), N, N), lambda b: (b, 0, 0)),
                        cspec((F_in, F_out_p), lambda b: (0, 0)),
                        cspec((1, F_out_p), lambda b: (0, 0)),
                    ],
                    out_specs=pl.BlockSpec((pl.Squeezed(), N, F_out_p),
                                           lambda b: (b, 0, 0)),
                ),
                compiler_params=pltpu.CompilerParams(
                    dimension_semantics=("parallel",),
                    vmem_limit_bytes=_limit(fused_foot)),
                cost_estimate=cost,
            )(ops, adj, wt, b2)

        out_p = _try_single_buffer(call)
        return out_p[:, :, :F_out] if F_out_p != F_out else out_p

    # ------------------------------- row-tiled path ---------------------------------
    if decouple_support is None:
        decouple_support = (B == 1)     # row tiles become 'parallel' -> both v7x cores

    # Row tile: multiple of 16 (bf16 sublane packing), shrunk until it fits the budget.
    tile_m = max(16, min(int(tm), N))
    if tile_m < N:
        tile_m = min(_round_up(tile_m, 16), N)

    def tiled_foot(tm_):
        foot = (2 * tm_ * N * isz_adj                    # adj row tiles, double-buffered
                + F_in * F_out_p * csz + F_out_p * 4     # weight + bias
                + 2 * tm_ * F_out_p * osz                # out tiles, double-buffered
                + 2 * tm_ * F_out_p * 4)                 # live f32 accumulator
        if decouple_support:
            foot += N * F_out_p * csz                    # support input block
        else:
            foot += N * F_in * isz_ops + N * F_out_p * csz   # ops block + support scratch
        return foot

    while tile_m > 16 and tiled_foot(tile_m) > budget:
        tile_m = max(16, _round_up(tile_m // 2, 16))
    tile_m = min(tile_m, N)

    grid = (B, pl.cdiv(N, tile_m))
    vlim = _limit(tiled_foot(tile_m))

    if decouple_support:
        # Small per-batch support matmul in plain XLA (scheduled around the kernel via
        # the CostEstimate); makes every (b, j) grid point independent.
        support = jnp.einsum(
            "bnf,fo->bno", ops.astype(compute_dtype), wt,
            preferred_element_type=jnp.float32).astype(compute_dtype)

        def call(single_buffer):
            def cspec(shape, imap):
                if single_buffer:
                    return pl.BlockSpec(shape, imap, pipeline_mode=pl.Buffered(1))
                return pl.BlockSpec(shape, imap)

            return pl.pallas_call(
                _gcn_rows_kernel,
                out_shape=jax.ShapeDtypeStruct((B, N, F_out_p), out_dtype),
                grid_spec=pltpu.PrefetchScalarGridSpec(
                    num_scalar_prefetch=0,
                    grid=grid,
                    in_specs=[
                        cspec((pl.Squeezed(), N, F_out_p), lambda b, j: (b, 0, 0)),
                        pl.BlockSpec((pl.Squeezed(), tile_m, N),
                                     lambda b, j: (b, j, 0)),
                        cspec((1, F_out_p), lambda b, j: (0, 0)),
                    ],
                    out_specs=pl.BlockSpec((pl.Squeezed(), tile_m, F_out_p),
                                           lambda b, j: (b, j, 0)),
                ),
                compiler_params=pltpu.CompilerParams(
                    dimension_semantics=("parallel", "parallel"),
                    vmem_limit_bytes=vlim),
                cost_estimate=cost,
            )(support, adj, b2)

        out_p = _try_single_buffer(call)
    else:
        def call(single_buffer):
            def cspec(shape, imap):
                if single_buffer:
                    return pl.BlockSpec(shape, imap, pipeline_mode=pl.Buffered(1))
                return pl.BlockSpec(shape, imap)

            return pl.pallas_call(
                _gcn_tiled_kernel,
                out_shape=jax.ShapeDtypeStruct((B, N, F_out_p), out_dtype),
                grid_spec=pltpu.PrefetchScalarGridSpec(
                    num_scalar_prefetch=0,
                    grid=grid,
                    in_specs=[
                        cspec((pl.Squeezed(), N, F_in), lambda b, j: (b, 0, 0)),
                        pl.BlockSpec((pl.Squeezed(), tile_m, N),
                                     lambda b, j: (b, j, 0)),
                        cspec((F_in, F_out_p), lambda b, j: (0, 0)),
                        cspec((1, F_out_p), lambda b, j: (0, 0)),
                    ],
                    out_specs=pl.BlockSpec((pl.Squeezed(), tile_m, F_out_p),
                                           lambda b, j: (b, j, 0)),
                    scratch_shapes=[pltpu.VMEM((N, F_out_p), compute_dtype)],
                ),
                compiler_params=pltpu.CompilerParams(
                    dimension_semantics=("parallel", "arbitrary"),
                    vmem_limit_bytes=vlim),
                cost_estimate=cost,
            )(ops, adj, wt, b2)

        out_p = _try_single_buffer(call)

    return out_p[:, :, :F_out] if F_out_p != F_out else out_p


# --------------------------------------------------------------------------- testing


def reference(ops, adj, weight, bias):
    hp = jax.lax.Precision.HIGHEST
    support = jnp.einsum("bnf,of->bno", ops, weight, precision=hp)
    out = jnp.maximum(jnp.einsum("bnm,bmo->bno", adj, support, precision=hp), 0.0)
    return out + bias[None, None, :]


if __name__ == "__main__":
    key = jax.random.PRNGKey(0)

    def make_inputs(k, B, N, F_in, F_out):
        k_ops, k_adj, k_w, k_b = jax.random.split(k, 4)
        ops = jax.random.normal(k_ops, (B, N, F_in), dtype=jnp.float32)
        adj_raw = jax.random.uniform(k_adj, (B, N, N), dtype=jnp.float32)
        adj = adj_raw / jnp.sum(adj_raw, axis=-1, keepdims=True)
        bound_w = math.sqrt(6.0 / F_in)  # kaiming-uniform-like
        weight = jax.random.uniform(k_w, (F_out, F_in), dtype=jnp.float32,
                                    minval=-bound_w, maxval=bound_w)
        stdv = 1.0 / math.sqrt(F_in)
        bias = jax.random.uniform(k_b, (F_out,), dtype=jnp.float32,
                                  minval=-stdv, maxval=stdv)
        return ops, adj, weight, bias

    k1, k2, k3 = jax.random.split(key, 3)

    # Case 1: tiny module-consistent shapes (B=2, N=8, 16->32) -> fused, batch-parallel.
    ops, adj, weight, bias = make_inputs(k1, 2, 8, 16, 32)
    ref = reference(ops, adj, weight, bias)

    out_f32 = jax.block_until_ready(
        graph_convolution(ops, adj, weight, bias, compute_dtype=jnp.float32))
    assert out_f32.shape == (2, 8, 32)
    assert jnp.allclose(out_f32, ref, atol=1e-4, rtol=1e-4)

    out_bf16 = jax.block_until_ready(graph_convolution(ops, adj, weight, bias))
    assert out_bf16.shape == (2, 8, 32)
    assert jnp.allclose(out_bf16, ref, atol=5e-2, rtol=5e-2)

    # Case 2: larger graph forcing the row-tiled kernel with in-VMEM support scratch
    # (B=2 -> grid (2, 2), batch 'parallel', row tiles 'arbitrary').
    ops2, adj2, weight2, bias2 = make_inputs(k2, 2, 256, 96, 80)
    ref2 = reference(ops2, adj2, weight2, bias2)

    out2_f32 = jax.block_until_ready(
        graph_convolution(ops2, adj2, weight2, bias2, tm=128, force_tiled=True,
                          compute_dtype=jnp.float32))
    assert out2_f32.shape == (2, 256, 80)
    assert jnp.allclose(out2_f32, ref2, atol=1e-3, rtol=1e-3)

    out2 = jax.block_until_ready(
        graph_convolution(ops2, adj2, weight2, bias2, tm=128, force_tiled=True))
    assert jnp.allclose(out2, ref2, atol=1e-1, rtol=5e-2)

    # Case 3: B=1 -> decoupled support, fully 'parallel' row-tile grid.
    ops3, adj3, weight3, bias3 = make_inputs(k3, 1, 256, 64, 128)
    ref3 = reference(ops3, adj3, weight3, bias3)
    out3 = jax.block_until_ready(
        graph_convolution(ops3, adj3, weight3, bias3, force_tiled=True))
    assert out3.shape == (1, 256, 128)
    assert jnp.allclose(out3, ref3, atol=1e-1, rtol=5e-2)

    print("KERNEL_OK")
</pallas_src>

<mosaic_0001>
module attributes {stable_mosaic.version = 11 : i64} {
  func.func @_gcn_fused_kernel(%arg0: i32, %arg1: memref<1x8x16xf32, #tpu.memory_space<vmem>>, %arg2: memref<1x8x8xf32, #tpu.memory_space<vmem>>, %arg3: memref<16x128xf32, #tpu.memory_space<vmem>>, %arg4: memref<1x128xf32, #tpu.memory_space<vmem>>, %arg5: memref<1x8x128xf32, #tpu.memory_space<vmem>>) attributes {dimension_semantics = [#tpu.dimension_semantics<parallel>], iteration_bounds = array<i64: 2>, scalar_prefetch = 0 : i64, scratch_operands = 0 : i64, tpu.core_type = #tpu.core_type<tc>, window_params = [{transform_indices = @transform_0, window_bounds = array<i64: 1, 8, 16>}, {transform_indices = @transform_1, window_bounds = array<i64: 1, 8, 8>}, {pipeline_mode = #tpu.pipeline_mode<synchronous>, transform_indices = @transform_2, window_bounds = array<i64: 16, 128>}, {pipeline_mode = #tpu.pipeline_mode<synchronous>, transform_indices = @transform_3, window_bounds = array<i64: 1, 128>}, {transform_indices = @transform_4, window_bounds = array<i64: 1, 8, 128>}]} {
    %c0 = arith.constant 0 : index
    %c0_0 = arith.constant 0 : index
    %c0_1 = arith.constant 0 : index
    %0 = vector.load %arg1[%c0, %c0_0, %c0_1] : memref<1x8x16xf32, #tpu.memory_space<vmem>>, vector<1x8x16xf32>
    %1 = vector.shape_cast %0 : vector<1x8x16xf32> to vector<8x16xf32>
    %c0_2 = arith.constant 0 : index
    %c0_3 = arith.constant 0 : index
    %2 = vector.load %arg3[%c0_2, %c0_3] : memref<16x128xf32, #tpu.memory_space<vmem>>, vector<16x128xf32>
    %cst = arith.constant dense<0.000000e+00> : vector<8x128xf32>
    %3 = tpu.matmul %1, %2, %cst {dimension_numbers = #tpu.dot_dimension_numbers<[1], [0], [0], [1], [0, 0, 1, 1], [], []>} : vector<8x16xf32>, vector<16x128xf32>, vector<8x128xf32> -> vector<8x128xf32>
    %c0_4 = arith.constant 0 : index
    %c0_5 = arith.constant 0 : index
    %c0_6 = arith.constant 0 : index
    %4 = vector.load %arg2[%c0_4, %c0_5, %c0_6] : memref<1x8x8xf32, #tpu.memory_space<vmem>>, vector<1x8x8xf32>
    %5 = vector.shape_cast %4 : vector<1x8x8xf32> to vector<8x8xf32>
    %cst_7 = arith.constant dense<0.000000e+00> : vector<8x128xf32>
    %6 = tpu.matmul %5, %3, %cst_7 {dimension_numbers = #tpu.dot_dimension_numbers<[1], [0], [0], [1], [0, 0, 1, 1], [], []>} : vector<8x8xf32>, vector<8x128xf32>, vector<8x128xf32> -> vector<8x128xf32>
    %cst_8 = arith.constant 0.000000e+00 : f32
    %7 = vector.broadcast %cst_8 : f32 to vector<8x128xf32>
    %8 = arith.maximumf %6, %7 : vector<8x128xf32>
    %c0_9 = arith.constant 0 : index
    %c0_10 = arith.constant 0 : index
    %9 = vector.load %arg4[%c0_9, %c0_10] : memref<1x128xf32, #tpu.memory_space<vmem>>, vector<1x128xf32>
    %10 = vector.broadcast %9 : vector<1x128xf32> to vector<8x128xf32>
    %11 = arith.addf %8, %10 : vector<8x128xf32>
    %c0_11 = arith.constant 0 : index
    %c0_12 = arith.constant 0 : index
    %c0_13 = arith.constant 0 : index
    %12 = vector.load %arg5[%c0_11, %c0_12, %c0_13] : memref<1x8x128xf32, #tpu.memory_space<vmem>>, vector<1x8x128xf32>
    %13 = vector.shape_cast %12 : vector<1x8x128xf32> to vector<8x128xf32>
    %14 = vector.shape_cast %11 : vector<8x128xf32> to vector<1x8x128xf32>
    tpu.vector_store %arg5[%c0_11, %c0_12, %c0_13], %14 {strides = array<i32>} : memref<1x8x128xf32, #tpu.memory_space<vmem>>, vector<1x8x128xf32>,
    return
  }
  func.func @transform_0(%arg0: i32) -> (i32, i32, i32) {
    %c0_i32 = arith.constant 0 : i32
    %c0_i32_0 = arith.constant 0 : i32
    %c0_i32_1 = arith.constant 0 : i32
    return %arg0, %c0_i32, %c0_i32_0 : i32, i32, i32
  }
  func.func @transform_1(%arg0: i32) -> (i32, i32, i32) {
    %c0_i32 = arith.constant 0 : i32
    %c0_i32_0 = arith.constant 0 : i32
    %c0_i32_1 = arith.constant 0 : i32
    return %arg0, %c0_i32, %c0_i32_0 : i32, i32, i32
  }
  func.func @transform_2(%arg0: i32) -> (i32, i32) {
    %c0_i32 = arith.constant 0 : i32
    %c0_i32_0 = arith.constant 0 : i32
    %c0_i32_1 = arith.constant 0 : i32
    return %c0_i32, %c0_i32_0 : i32, i32
  }
  func.func @transform_3(%arg0: i32) -> (i32, i32) {
    %c0_i32 = arith.constant 0 : i32
    %c0_i32_0 = arith.constant 0 : i32
    %c0_i32_1 = arith.constant 0 : i32
    return %c0_i32, %c0_i32_0 : i32, i32
  }
  func.func @transform_4(%arg0: i32) -> (i32, i32, i32) {
    %c0_i32 = arith.constant 0 : i32
    %c0_i32_0 = arith.constant 0 : i32
    %c0_i32_1 = arith.constant 0 : i32
    return %arg0, %c0_i32, %c0_i32_0 : i32, i32, i32
  }
}

module attributes {stable_mosaic.version = 11 : i64} {
  func.func @_gcn_fused_kernel(%arg0: i32, %arg1: memref<1x8x16xf32, #tpu.memory_space<vmem>>, %arg2: memref<1x8x8xf32, #tpu.memory_space<vmem>>, %arg3: memref<16x128xf32, #tpu.memory_space<vmem>>, %arg4: memref<1x128xf32, #tpu.memory_space<vmem>>, %arg5: memref<1x8x128xf32, #tpu.memory_space<vmem>>) attributes {dimension_semantics = [#tpu.dimension_semantics<parallel>], iteration_bounds = array<i64: 2>, scalar_prefetch = 0 : i64, scratch_operands = 0 : i64, tpu.core_type = #tpu.core_type<tc>, window_params = [{transform_indices = @transform_0, window_bounds = array<i64: 1, 8, 16>}, {transform_indices = @transform_1, window_bounds = array<i64: 1, 8, 8>}, {pipeline_mode = #tpu.pipeline_mode<synchronous>, transform_indices = @transform_2, window_bounds = array<i64: 16, 128>}, {pipeline_mode = #tpu.pipeline_mode<synchronous>, transform_indices = @transform_3, window_bounds = array<i64: 1, 128>}, {transform_indices = @transform_4, window_bounds = array<i64: 1, 8, 128>}]} {
    %c0 = arith.constant 0 : index
    %c0_0 = arith.constant 0 : index
    %c0_1 = arith.constant 0 : index
    %0 = vector.load %arg1[%c0, %c0_0, %c0_1] : memref<1x8x16xf32, #tpu.memory_space<vmem>>, vector<1x8x16xf32>
    %1 = vector.shape_cast %0 : vector<1x8x16xf32> to vector<8x16xf32>
    %c0_2 = arith.constant 0 : index
    %c0_3 = arith.constant 0 : index
    %2 = vector.load %arg3[%c0_2, %c0_3] : memref<16x128xf32, #tpu.memory_space<vmem>>, vector<16x128xf32>
    %cst = arith.constant dense<0.000000e+00> : vector<8x128xf32>
    %3 = tpu.matmul %1, %2, %cst {dimension_numbers = #tpu.dot_dimension_numbers<[1], [0], [0], [1], [0, 0, 1, 1], [], []>} : vector<8x16xf32>, vector<16x128xf32>, vector<8x128xf32> -> vector<8x128xf32>
    %c0_4 = arith.constant 0 : index
    %c0_5 = arith.constant 0 : index
    %c0_6 = arith.constant 0 : index
    %4 = vector.load %arg2[%c0_4, %c0_5, %c0_6] : memref<1x8x8xf32, #tpu.memory_space<vmem>>, vector<1x8x8xf32>
    %5 = vector.shape_cast %4 : vector<1x8x8xf32> to vector<8x8xf32>
    %cst_7 = arith.constant dense<0.000000e+00> : vector<8x128xf32>
    %6 = tpu.matmul %5, %3, %cst_7 {dimension_numbers = #tpu.dot_dimension_numbers<[1], [0], [0], [1], [0, 0, 1, 1], [], []>} : vector<8x8xf32>, vector<8x128xf32>, vector<8x128xf32> -> vector<8x128xf32>
    %cst_8 = arith.constant 0.000000e+00 : f32
    %7 = vector.broadcast %cst_8 : f32 to vector<8x128xf32>
    %8 = arith.maximumf %6, %7 : vector<8x128xf32>
    %c0_9 = arith.constant 0 : index
    %c0_10 = arith.constant 0 : index
    %9 = vector.load %arg4[%c0_9, %c0_10] : memref<1x128xf32, #tpu.memory_space<vmem>>, vector<1x128xf32>
    %10 = vector.broadcast %9 : vector<1x128xf32> to vector<8x128xf32>
    %11 = arith.addf %8, %10 : vector<8x128xf32>
    %c0_11 = arith.constant 0 : index
    %c0_12 = arith.constant 0 : index
    %c0_13 = arith.constant 0 : index
    %12 = vector.load %arg5[%c0_11, %c0_12, %c0_13] : memref<1x8x128xf32, #tpu.memory_space<vmem>>, vector<1x8x128xf32>
    %13 = vector.shape_cast %12 : vector<1x8x128xf32> to vector<8x128xf32>
    %14 = vector.shape_cast %11 : vector<8x128xf32> to vector<1x8x128xf32>
    tpu.vector_store %arg5[%c0_11, %c0_12, %c0_13], %14 {strides = array<i32>} : memref<1x8x128xf32, #tpu.memory_space<vmem>>, vector<1x8x128xf32>,
    return
  }
  func.func @transform_0(%arg0: i32) -> (i32, i32, i32) {
    %c0_i32 = arith.constant 0 : i32
    %c0_i32_0 = arith.constant 0 : i32
    %c0_i32_1 = arith.constant 0 : i32
    return %arg0, %c0_i32, %c0_i32_0 : i32, i32, i32
  }
  func.func @transform_1(%arg0: i32) -> (i32, i32, i32) {
    %c0_i32 = arith.constant 0 : i32
    %c0_i32_0 = arith.constant 0 : i32
    %c0_i32_1 = arith.constant 0 : i32
    return %arg0, %c0_i32, %c0_i32_0 : i32, i32, i32
  }
  func.func @transform_2(%arg0: i32) -> (i32, i32) {
    %c0_i32 = arith.constant 0 : i32
    %c0_i32_0 = arith.constant 0 : i32
    %c0_i32_1 = arith.constant 0 : i32
    return %c0_i32, %c0_i32_0 : i32, i32
  }
  func.func @transform_3(%arg0: i32) -> (i32, i32) {
    %c0_i32 = arith.constant 0 : i32
    %c0_i32_0 = arith.constant 0 : i32
    %c0_i32_1 = arith.constant 0 : i32
    return %c0_i32, %c0_i32_0 : i32, i32
  }
  func.func @transform_4(%arg0: i32) -> (i32, i32, i32) {
    %c0_i32 = arith.constant 0 : i32
    %c0_i32_0 = arith.constant 0 : i32
    %c0_i32_1 = arith.constant 0 : i32
    return %arg0, %c0_i32, %c0_i32_0 : i32, i32, i32
  }
}

</mosaic_0001>

<bundles_post_ra>
// kernel: tpu_custom_call.1
= control target key start
LH: loop header
LB: loop body
LE: loop exit
PB: predicated region body
PF: predicated region fallthrough
CT: control target
= control target key end

     0   :  { %s898_s0 = inlined_call_operand.hbm [shape: f32[2,8,16], index: 0, kind: input, shape index: {}]   ;;  %s899_s1 = inlined_call_operand.hbm [shape: f32[2,8,8], index: 1, kind: input, shape index: {}]   ;;  %s900_s2 = inlined_call_operand.hbm [shape: f32[16,128], index: 2, kind: input, shape index: {}]   ;;  %s901_s3 = inlined_call_operand.vmem [shape: f32[1,128], index: 3, kind: input, shape index: {}]   ;;  %s902_s4 = inlined_call_operand.hbm [shape: f32[2,8,128], index: 4, kind: output, shape index: {}]  }
   0x1   :  { %904 = sst [smem:[#allocation15_spill]] %s900_s2 }
   0x2   :  { %9 = vsyncpa [#allocation3], 0 }
   0x3   :  { %11 = vsyncpa [#allocation3 + $0x1], 0 }
   0x4   :  { %12 = vsyncpa [#allocation6], 0 }
   0x5   :  { %14 = vsyncpa [#allocation6 + $0x1], 0 }
   0x6   :  { %15 = vsyncpa [#allocation4], 0 }
   0x7   :  { %17 = vsyncpa [#allocation4 + $0x1], 0  ;;  %s725_s15 = smov 0   ;;  %s727_s16 = smov 0  }
   0x8   :  { %s729_s17 = smov 0   ;;  %s731_s18 = smov 0  }
   0x9 LB: > { %905 = sst [smem:[#allocation13_spill]] %s691_s17  ;;  %s749_s22 = sadd.s32 4294967295, %s695_s18   ;;  %s695_s18 = sphi %s731_s18, %s919_s18   ;;  %s691_s17 = sphi %s729_s17, %s916_s17   ;;  %s687_s16 = sphi %s727_s16, %s918_s16   ;;  %s683_s15 = sphi %s725_s15, %s917_s15  }
   0xa   : > { %s906_s2 = sld [smem:[#allocation15_spill]]  ;;  %p448_p0 = scmp.ge.s32.totalorder %s695_s18, 1 }
   0xb   : > { %p44_p1 = scmp.eq.s32.totalorder %s749_s22, 0  ;;  %p148_p2 = scmp.lt.s32.totalorder %s695_s18, 3 }
   0xc   : > { %s697_s24 = smov [#allocation7]   ;;  %s698_s26 = smov 128  }
   0xd   : > { %p754_p3 = pnand %p448_p0, %p148_p2  ;;  %s161_s25 = sshll.u32 %s697_s24, 4  ;;  %s162_s25 = int_to_ptr.vmem [resolvable:$true] %s161_s25 }
   0xe   : > { %s699_s27 = smov 8   ;;  %s447_s28 = sadd.s32 4294967294, %s695_s18  }
   0xf   : > { %p476_p4 = pneg %p754_p3  ;;  %s765_s29 = sadd.s32 1, %s695_s18  }
  0x10   : > { %s159_s21 = sshll.u32 %s906_s2, 4  ;;  %s30_s30 = sadd.s32 1, %s691_s17  ;;  %s160_s21 = int_to_ptr.hbm [resolvable:$true] %s159_s21 }
  0x11   : > { %p477_p6 = pnand %p476_p4, %p44_p1  ;;  %s27_s5 = ssub.s32 %s695_s18, %s765_s29 }
  0x12   : > { %p37_p7 = scmp.ne.s32.totalorder %s691_s17, %s687_s16  ;;  %p28_p8 = scmp.eq.s32.totalorder %s27_s5, 0 }
  0x13   : > { %479 = dma.hbm_to_vmem [thread:$0]  (!%p477_p6), %s160_s21, 256, %s162_s25, [#allocation6], %s698_s26, %s698_s26, %s699_s27  }
  0x14   : > { %p38_p9 = scmp.eq.s32.totalorder %s695_s18, 0  ;;  %p43_p10 = scmp.ne.s32.totalorder %s687_s16, %s683_s15 }
  0x15   : > { %p135_p11 = scmp.eq.s32.totalorder %s749_s22, 1  ;;  %p141_p2 = scmp.eq.s32.totalorder %s447_s28, 1 }
  0x16   : > { %s777_s6 = scalar_select %p28_p8, %s691_s17, %s30_s30  }
  0x17   : > { %p779_p12 = por %p38_p9, %p37_p7  ;;  %p785_p13 = por %p44_p1, %p43_p10 }
  0x18   : > { %908 = sst [smem:[#allocation14_spill]] %s777_s6  ;;  %p789_p0 = por %p135_p11, %p37_p7 }
  0x19   : > { %p492_p4 = scmp.lt.s32.totalorder %s695_s18, 2  ;;  %s178_s10 = sand.u32 1, %s691_s17  }
  0x1a   : > { %p795_p6 = por %p141_p2, %p43_p10  ;;  %s451_s12 = sshll.u32 %s178_s10, 3 }
  0x1b   : > { %s452_s13 = sshll.u32 %s695_s18, 3  ;;  %s182_s24 = scalar_lea.vmem [#allocation2], %s451_s12 }
  0x1c   : > { %s186_s20 = scalar_lea.hbm %s898_s0, %s452_s13  ;;  %s190_s25 = sshll.u32 %s182_s24, 4  ;;  %s191_s25 = int_to_ptr.vmem [resolvable:$true] %s190_s25 }
  0x1d   : > { %s188_s21 = sshll.u32 %s186_s20, 4  ;;  %p805_p7 = pnand %p492_p4, %p779_p12  ;;  %s189_s21 = int_to_ptr.hbm [resolvable:$true] %s188_s21 }
  0x1e   : > { %s205_s30 = scalar_lea.hbm %s899_s1, %s452_s13  ;;  %s197_s5 = sand.u32 1, %s695_s18  }
  0x1f   : > { %s179_s2 = scalar_lea.sflag [#allocation3], %s178_s10  ;;  %s561_s14 = sshra.s32 %s189_s21, 4  ;;  %s562_s14 = int_to_ptr.hbm [resolvable:$true] %s561_s14 }
  0x20   : > { %s563_s19 = scalar_lea.hbm %s562_s14, 8  ;;  %p565_p9 = pneg %p805_p7 }
  0x21   : > { %p564_p8 = scmp.ne.s32.totalorder %s562_s14, %s563_s19  ;;  %s568_s24 = scalar_lea.hbm %s898_s0, 16 }
  0x22   : > { %p569_p12 = scmp.lt.s32.totalorder %s562_s14, %s898_s0  ;;  %p570_p2 = scmp.lt.s32.totalorder %s568_s24, %s563_s19 }
  0x23   : > { %p566_p10 = pnand %p565_p9, %p564_p8 }
  0x24   : > { %p571_p4 = por %p570_p2, %p569_p12 }
  0x25   : > { %p567_p11 = pneg %p566_p10 }
  0x27   : > { %p572_p5 = pnand %p571_p4, %p567_p11 }
  0x29   : > { %575 = shalt.err (!%p572_p5)
}
  0x2a   : > { %483 = dma.hbm_to_vmem [thread:$0]  (!%p805_p7), %s189_s21, 128, %s191_s25, %s179_s2  }
  0x2b   : > { %s207_s10 = sshll.u32 %s205_s30, 4  ;;  %s201_s13 = scalar_lea.vmem [#allocation5], %s451_s12  ;;  %s208_s10 = int_to_ptr.hbm [resolvable:$true] %s207_s10 }
  0x2c   : > { %s209_s6 = sshll.u32 %s201_s13, 4  ;;  %s198_s17 = scalar_lea.sflag [#allocation6], %s197_s5  ;;  %s210_s6 = int_to_ptr.vmem [resolvable:$true] %s209_s6 }
  0x2d   : > { %s591_s7 = sshra.s32 %s208_s10, 4  ;;  %s598_s24 = scalar_lea.hbm %s899_s1, 16  ;;  %s592_s7 = int_to_ptr.hbm [resolvable:$true] %s591_s7 }
  0x2e   : > { %s593_s20 = scalar_lea.hbm %s592_s7, 8  ;;  %p599_p5 = scmp.lt.s32.totalorder %s592_s7, %s899_s1 }
  0x2f   : > { %p594_p8 = scmp.ne.s32.totalorder %s592_s7, %s593_s20  ;;  %p600_p11 = scmp.lt.s32.totalorder %s598_s24, %s593_s20 }
  0x31   : > { %p596_p10 = pnand %p594_p8, %p565_p9  ;;  %p601_p2 = por %p600_p11, %p599_p5 }
  0x33   : > { %p597_p12 = pneg %p596_p10 }
  0x35   : > { %p602_p4 = pnand %p601_p2, %p597_p12 }
  0x37   : > { %605 = shalt.err (!%p602_p4)
}
  0x38   : > { %486 = dma.hbm_to_vmem [thread:$0]  (!%p805_p7), %s208_s10, 128, %s210_s6, %s198_s17  }
  0x39   : > { %218 = sbr.rel (%p754_p3) target bundleno = 332 (0x14c), region = 36  ;;  %s840_s12 = sand.u32 (!%p754_p3), 1, %s687_s16  }
  0x3a   : > { %s843_s21 = sshll.u32 (!%p754_p3), %s840_s12, 3  ;;  %s221_s25 = scalar_lea.sflag (!%p754_p3), [#allocation3], %s840_s12 }
  0x3b   : > { %s224_s30 = scalar_lea.vmem (!%p754_p3), [#allocation2], %s843_s21 }
  0x3e   : > { %666 = dma.done.wait (%p785_p13), %s221_s25, 128  }
  0x3f   : > { %668 = vsyncadd (%p785_p13), %s221_s25, 4294967168  ;;  %s230_s17 = sand.u32 1, %s749_s22   ;;  %s234_s6 = scalar_lea.vmem [#allocation5], %s843_s21 }
  0x40   : > { %s231_s23 = scalar_lea.sflag [#allocation6], %s230_s17 }
  0x41   : > { %670 = dma.done.wait (%p785_p13), %s231_s23, 128  }
  0x42   : > { %672 = vsyncadd (%p785_p13), %s231_s23, 4294967168 }
  0x43   : > { %674 = dma.done.wait (%p44_p1), [#allocation6], 256  }
  0x44   : > { %676 = vsyncadd (%p44_p1), [#allocation6], 4294967040  ;;  %v272_v0 = vld [vmem:[#allocation7 + $0x8] sm:$0xff]  ;;  %v271_v1 = vld [vmem:[#allocation7] sm:$0xff]  ;;  %vm273_vm0 = vcmask 130048   ;;  %vm298_vm1 = vcmask 64512  }
  0x45   : > { %291 = vmatpush.msra.mxu0 %v272_v0  ;;  %v270_v2 = vld [vmem:[%s224_s30] sm:$0xff]  ;;  %v297_v3 = vld [vmem:[%s234_s6] sm:$0xff]  ;;  %s463_s8 = sshll.u32 %s749_s22, 3  ;;  %s269_s7 = scalar_lea.vmem [#allocation8], %s843_s21 }
  0x46   : > { %s340_s28 = scalar_lea.hbm %s902_s4, %s463_s8  ;;  %v530_v5 = vld [vmem:[%s901_s3] ss:$0 sm:$0xff]  ;;  %s342_s20 = sshll.u32 %s269_s7, 4  ;;  %s343_s20 = int_to_ptr.vmem [resolvable:$true] %s342_s20 }
  0x47   : > { %292 = vmatpush.msra.mxu0 %v271_v1  ;;  %s344_s14 = sshll.u32 %s340_s28, 4  ;;  %s330_s19 = scalar_lea.sflag [#allocation4], %s840_s12  ;;  %s345_s14 = int_to_ptr.hbm [resolvable:$true] %s344_s14 }
  0x48   : > { %460 = vmatmul.msk.f32.vlgmr.msra.gmra.mxu0 %vm273_vm0, %v270_v2  ;;  %s635_s22 = sshra.s32 %s345_s14, 4  ;;  %s641_s25 = scalar_lea.hbm %s902_s4, 16  ;;  %s636_s22 = int_to_ptr.hbm [resolvable:$true] %s635_s22 }
  0x49   : > { %s637_s24 = scalar_lea.hbm %s636_s22, 8  ;;  %p642_p7 = scmp.lt.s32.totalorder %s636_s22, %s902_s4 }
  0x4a   : > { %p638_p1 = scmp.ne.s32.totalorder %s636_s22, %s637_s24  ;;  %p643_p9 = scmp.lt.s32.totalorder %s641_s25, %s637_s24 }
  0x4c   : > { %p639_p3 = pnand %p638_p1, %p789_p0  ;;  %p644_p8 = por %p643_p9, %p642_p7 }
  0x4e   : > { %p640_p13 = pneg %p639_p3 }
  0x50   : > { %p645_p10 = pnand %p644_p8, %p640_p13 }
  0xc5   : > { %v294_v4 = vpop.f32.mrf.mxu0 }
  0xc6   : > { %317 = vmatpush.msra.mxu1 %v294_v4 }
  0xc7   : > { %461 = vmatmul.msk.f32.vlgmr.msra.gmra.mxu1 %vm298_vm1, %v297_v3 }
 0x144   : > { %v319_v6 = vpop.f32.mrf.mxu1 }
 0x145   : > { %v322_v7 = vmax.f32 %v319_v6, 0.0 }
 0x147   : > { %v327_v8 = vadd.f32 %v530_v5, %v322_v7 }
 0x149   : > { %328 = vst [vmem:[%s269_s7] sm:$0xff] %v327_v8 }
 0x14a   : > { %648 = shalt.err (!%p645_p10)
}
 0x14b   : > { %474 = dma.vmem_to_hbm [thread:$0]  (%p789_p0), %s343_s20, 128, %s345_s14, %s330_s19  }
 0x14c PF: > { %s356_s12 = sand.u32 1, %s683_s15   ;;  %p914_p12 = scmp.ge.s32.totalorder %s695_s18, 2 }
 0x14d   : > { %s357_s17 = scalar_lea.sflag [#allocation4], %s356_s12 }
 0x14e   : > { %p488_p5 = pnand %p914_p12, %p795_p6 }
 0x150   : > { %p489_p11 = pneg %p488_p5 }
 0x152   : > { %678 = dma.done.wait (%p489_p11), %s357_s17, 128  }
 0x153   : > { %680 = vsyncadd (%p489_p11), %s357_s17, 4294967168  ;;  %s915_s23 = sld [smem:[#allocation13_spill]]  ;;  %p20_p2 = scmp.ge.s32.totalorder %s765_s29, 4  }
 0x154   : > { %s916_s17 = sld [smem:[#allocation14_spill]]  ;;  %s917_s15 = smov %s687_s16 }
 0x155   : > { %s919_s18 = smov %s765_s29  ;;  %22 = sbr.rel (!%p20_p2) target bundleno = 9 (0x9), region = 98 }
 0x159   : > { %s918_s16 = smov %s915_s23 }
 0x15a   :  { %363 = vsyncpa [#allocation3], 1 }
 0x15b   :  { %365 = vsyncpa [#allocation3 + $0x1], 1 }
 0x15c   :  { %366 = vsyncpa [#allocation6], 1 }
 0x15d   :  { %368 = vsyncpa [#allocation6 + $0x1], 1 }
 0x15e   :  { %369 = vsyncpa [#allocation4], 1 }
 0x15f   :  { %371 = vsyncpa [#allocation4 + $0x1], 1 }

// kernel: tpu_custom_call.1
= control target key start
LH: loop header
LB: loop body
LE: loop exit
PB: predicated region body
PF: predicated region fallthrough
CT: control target
= control target key end

     0   :  { %s898_s0 = inlined_call_operand.hbm [shape: f32[2,8,16], index: 0, kind: input, shape index: {}]   ;;  %s899_s1 = inlined_call_operand.hbm [shape: f32[2,8,8], index: 1, kind: input, shape index: {}]   ;;  %s900_s2 = inlined_call_operand.hbm [shape: f32[16,128], index: 2, kind: input, shape index: {}]   ;;  %s901_s3 = inlined_call_operand.vmem [shape: f32[1,128], index: 3, kind: input, shape index: {}]   ;;  %s902_s4 = inlined_call_operand.hbm [shape: f32[2,8,128], index: 4, kind: output, shape index: {}]  }
   0x1   :  { %904 = sst [smem:[#allocation15_spill]] %s900_s2 }
   0x2   :  { %9 = vsyncpa [#allocation3], 0 }
   0x3   :  { %11 = vsyncpa [#allocation3 + $0x1], 0 }
   0x4   :  { %12 = vsyncpa [#allocation6], 0 }
   0x5   :  { %14 = vsyncpa [#allocation6 + $0x1], 0 }
   0x6   :  { %15 = vsyncpa [#allocation4], 0 }
   0x7   :  { %17 = vsyncpa [#allocation4 + $0x1], 0  ;;  %s725_s15 = smov 0   ;;  %s727_s16 = smov 0  }
   0x8   :  { %s729_s17 = smov 0   ;;  %s731_s18 = smov 0  }
   0x9 LB: > { %905 = sst [smem:[#allocation13_spill]] %s691_s17  ;;  %s749_s22 = sadd.s32 4294967295, %s695_s18   ;;  %s695_s18 = sphi %s731_s18, %s919_s18   ;;  %s691_s17 = sphi %s729_s17, %s916_s17   ;;  %s687_s16 = sphi %s727_s16, %s918_s16   ;;  %s683_s15 = sphi %s725_s15, %s917_s15  }
   0xa   : > { %s906_s2 = sld [smem:[#allocation15_spill]]  ;;  %p448_p0 = scmp.ge.s32.totalorder %s695_s18, 1 }
   0xb   : > { %p44_p1 = scmp.eq.s32.totalorder %s749_s22, 0  ;;  %p148_p2 = scmp.lt.s32.totalorder %s695_s18, 3 }
   0xc   : > { %s697_s24 = smov [#allocation7]   ;;  %s698_s26 = smov 128  }
   0xd   : > { %p754_p3 = pnand %p448_p0, %p148_p2  ;;  %s161_s25 = sshll.u32 %s697_s24, 4  ;;  %s162_s25 = int_to_ptr.vmem [resolvable:$true] %s161_s25 }
   0xe   : > { %s699_s27 = smov 8   ;;  %s447_s28 = sadd.s32 4294967294, %s695_s18  }
   0xf   : > { %p476_p4 = pneg %p754_p3  ;;  %s765_s29 = sadd.s32 1, %s695_s18  }
  0x10   : > { %s159_s21 = sshll.u32 %s906_s2, 4  ;;  %s30_s30 = sadd.s32 1, %s691_s17  ;;  %s160_s21 = int_to_ptr.hbm [resolvable:$true] %s159_s21 }
  0x11   : > { %p477_p6 = pnand %p476_p4, %p44_p1  ;;  %s27_s5 = ssub.s32 %s695_s18, %s765_s29 }
  0x12   : > { %p37_p7 = scmp.ne.s32.totalorder %s691_s17, %s687_s16  ;;  %p28_p8 = scmp.eq.s32.totalorder %s27_s5, 0 }
  0x13   : > { %479 = dma.hbm_to_vmem [thread:$0]  (!%p477_p6), %s160_s21, 256, %s162_s25, [#allocation6], %s698_s26, %s698_s26, %s699_s27  }
  0x14   : > { %p38_p9 = scmp.eq.s32.totalorder %s695_s18, 0  ;;  %p43_p10 = scmp.ne.s32.totalorder %s687_s16, %s683_s15 }
  0x15   : > { %p135_p11 = scmp.eq.s32.totalorder %s749_s22, 1  ;;  %p141_p2 = scmp.eq.s32.totalorder %s447_s28, 1 }
  0x16   : > { %s777_s6 = scalar_select %p28_p8, %s691_s17, %s30_s30  }
  0x17   : > { %p779_p12 = por %p38_p9, %p37_p7  ;;  %p785_p13 = por %p44_p1, %p43_p10 }
  0x18   : > { %908 = sst [smem:[#allocation14_spill]] %s777_s6  ;;  %p789_p0 = por %p135_p11, %p37_p7 }
  0x19   : > { %p492_p4 = scmp.lt.s32.totalorder %s695_s18, 2  ;;  %s178_s10 = sand.u32 1, %s691_s17  }
  0x1a   : > { %p795_p6 = por %p141_p2, %p43_p10  ;;  %s451_s12 = sshll.u32 %s178_s10, 3 }
  0x1b   : > { %s452_s13 = sshll.u32 %s695_s18, 3  ;;  %s182_s24 = scalar_lea.vmem [#allocation2], %s451_s12 }
  0x1c   : > { %s186_s20 = scalar_lea.hbm %s898_s0, %s452_s13  ;;  %s190_s25 = sshll.u32 %s182_s24, 4  ;;  %s191_s25 = int_to_ptr.vmem [resolvable:$true] %s190_s25 }
  0x1d   : > { %s188_s21 = sshll.u32 %s186_s20, 4  ;;  %p805_p7 = pnand %p492_p4, %p779_p12  ;;  %s189_s21 = int_to_ptr.hbm [resolvable:$true] %s188_s21 }
  0x1e   : > { %s205_s30 = scalar_lea.hbm %s899_s1, %s452_s13  ;;  %s197_s5 = sand.u32 1, %s695_s18  }
  0x1f   : > { %s179_s2 = scalar_lea.sflag [#allocation3], %s178_s10  ;;  %s561_s14 = sshra.s32 %s189_s21, 4  ;;  %s562_s14 = int_to_ptr.hbm [resolvable:$true] %s561_s14 }
  0x20   : > { %s563_s19 = scalar_lea.hbm %s562_s14, 8  ;;  %p565_p9 = pneg %p805_p7 }
  0x21   : > { %p564_p8 = scmp.ne.s32.totalorder %s562_s14, %s563_s19  ;;  %s568_s24 = scalar_lea.hbm %s898_s0, 16 }
  0x22   : > { %p569_p12 = scmp.lt.s32.totalorder %s562_s14, %s898_s0  ;;  %p570_p2 = scmp.lt.s32.totalorder %s568_s24, %s563_s19 }
  0x23   : > { %p566_p10 = pnand %p565_p9, %p564_p8 }
  0x24   : > { %p571_p4 = por %p570_p2, %p569_p12 }
  0x25   : > { %p567_p11 = pneg %p566_p10 }
  0x27   : > { %p572_p5 = pnand %p571_p4, %p567_p11 }
  0x29   : > { %575 = shalt.err (!%p572_p5)
}
  0x2a   : > { %483 = dma.hbm_to_vmem [thread:$0]  (!%p805_p7), %s189_s21, 128, %s191_s25, %s179_s2  }
  0x2b   : > { %s207_s10 = sshll.u32 %s205_s30, 4  ;;  %s201_s13 = scalar_lea.vmem [#allocation5], %s451_s12  ;;  %s208_s10 = int_to_ptr.hbm [resolvable:$true] %s207_s10 }
  0x2c   : > { %s209_s6 = sshll.u32 %s201_s13, 4  ;;  %s198_s17 = scalar_lea.sflag [#allocation6], %s197_s5  ;;  %s210_s6 = int_to_ptr.vmem [resolvable:$true] %s209_s6 }
  0x2d   : > { %s591_s7 = sshra.s32 %s208_s10, 4  ;;  %s598_s24 = scalar_lea.hbm %s899_s1, 16  ;;  %s592_s7 = int_to_ptr.hbm [resolvable:$true] %s591_s7 }
  0x2e   : > { %s593_s20 = scalar_lea.hbm %s592_s7, 8  ;;  %p599_p5 = scmp.lt.s32.totalorder %s592_s7, %s899_s1 }
  0x2f   : > { %p594_p8 = scmp.ne.s32.totalorder %s592_s7, %s593_s20  ;;  %p600_p11 = scmp.lt.s32.totalorder %s598_s24, %s593_s20 }
  0x31   : > { %p596_p10 = pnand %p594_p8, %p565_p9  ;;  %p601_p2 = por %p600_p11, %p599_p5 }
  0x33   : > { %p597_p12 = pneg %p596_p10 }
  0x35   : > { %p602_p4 = pnand %p601_p2, %p597_p12 }
  0x37   : > { %605 = shalt.err (!%p602_p4)
}
  0x38   : > { %486 = dma.hbm_to_vmem [thread:$0]  (!%p805_p7), %s208_s10, 128, %s210_s6, %s198_s17  }
  0x39   : > { %218 = sbr.rel (%p754_p3) target bundleno = 332 (0x14c), region = 36  ;;  %s840_s12 = sand.u32 (!%p754_p3), 1, %s687_s16  }
  0x3a   : > { %s843_s21 = sshll.u32 (!%p754_p3), %s840_s12, 3  ;;  %s221_s25 = scalar_lea.sflag (!%p754_p3), [#allocation3], %s840_s12 }
  0x3b   : > { %s224_s30 = scalar_lea.vmem (!%p754_p3), [#allocation2], %s843_s21 }
  0x3e   : > { %666 = dma.done.wait (%p785_p13), %s221_s25, 128  }
  0x3f   : > { %668 = vsyncadd (%p785_p13), %s221_s25, 4294967168  ;;  %s230_s17 = sand.u32 1, %s749_s22   ;;  %s234_s6 = scalar_lea.vmem [#allocation5], %s843_s21 }
  0x40   : > { %s231_s23 = scalar_lea.sflag [#allocation6], %s230_s17 }
  0x41   : > { %670 = dma.done.wait (%p785_p13), %s231_s23, 128  }
  0x42   : > { %672 = vsyncadd (%p785_p13), %s231_s23, 4294967168 }
  0x43   : > { %674 = dma.done.wait (%p44_p1), [#allocation6], 256  }
  0x44   : > { %676 = vsyncadd (%p44_p1), [#allocation6], 4294967040  ;;  %v272_v0 = vld [vmem:[#allocation7 + $0x8] sm:$0xff]  ;;  %v271_v1 = vld [vmem:[#allocation7] sm:$0xff]  ;;  %vm273_vm0 = vcmask 130048   ;;  %vm298_vm1 = vcmask 64512  }
  0x45   : > { %291 = vmatpush.msra.mxu0 %v272_v0  ;;  %v270_v2 = vld [vmem:[%s224_s30] sm:$0xff]  ;;  %v297_v3 = vld [vmem:[%s234_s6] sm:$0xff]  ;;  %s463_s8 = sshll.u32 %s749_s22, 3  ;;  %s269_s7 = scalar_lea.vmem [#allocation8], %s843_s21 }
  0x46   : > { %s340_s28 = scalar_lea.hbm %s902_s4, %s463_s8  ;;  %v530_v5 = vld [vmem:[%s901_s3] ss:$0 sm:$0xff]  ;;  %s342_s20 = sshll.u32 %s269_s7, 4  ;;  %s343_s20 = int_to_ptr.vmem [resolvable:$true] %s342_s20 }
  0x47   : > { %292 = vmatpush.msra.mxu0 %v271_v1  ;;  %s344_s14 = sshll.u32 %s340_s28, 4  ;;  %s330_s19 = scalar_lea.sflag [#allocation4], %s840_s12  ;;  %s345_s14 = int_to_ptr.hbm [resolvable:$true] %s344_s14 }
  0x48   : > { %460 = vmatmul.msk.f32.vlgmr.msra.gmra.mxu0 %vm273_vm0, %v270_v2  ;;  %s635_s22 = sshra.s32 %s345_s14, 4  ;;  %s641_s25 = scalar_lea.hbm %s902_s4, 16  ;;  %s636_s22 = int_to_ptr.hbm [resolvable:$true] %s635_s22 }
  0x49   : > { %s637_s24 = scalar_lea.hbm %s636_s22, 8  ;;  %p642_p7 = scmp.lt.s32.totalorder %s636_s22, %s902_s4 }
  0x4a   : > { %p638_p1 = scmp.ne.s32.totalorder %s636_s22, %s637_s24  ;;  %p643_p9 = scmp.lt.s32.totalorder %s641_s25, %s637_s24 }
  0x4c   : > { %p639_p3 = pnand %p638_p1, %p789_p0  ;;  %p644_p8 = por %p643_p9, %p642_p7 }
  0x4e   : > { %p640_p13 = pneg %p639_p3 }
  0x50   : > { %p645_p10 = pnand %p644_p8, %p640_p13 }
  0xc5   : > { %v294_v4 = vpop.f32.mrf.mxu0 }
  0xc6   : > { %317 = vmatpush.msra.mxu1 %v294_v4 }
  0xc7   : > { %461 = vmatmul.msk.f32.vlgmr.msra.gmra.mxu1 %vm298_vm1, %v297_v3 }
 0x144   : > { %v319_v6 = vpop.f32.mrf.mxu1 }
 0x145   : > { %v322_v7 = vmax.f32 %v319_v6, 0.0 }
 0x147   : > { %v327_v8 = vadd.f32 %v530_v5, %v322_v7 }
 0x149   : > { %328 = vst [vmem:[%s269_s7] sm:$0xff] %v327_v8 }
 0x14a   : > { %648 = shalt.err (!%p645_p10)
}
 0x14b   : > { %474 = dma.vmem_to_hbm [thread:$0]  (%p789_p0), %s343_s20, 128, %s345_s14, %s330_s19  }
 0x14c PF: > { %s356_s12 = sand.u32 1, %s683_s15   ;;  %p914_p12 = scmp.ge.s32.totalorder %s695_s18, 2 }
 0x14d   : > { %s357_s17 = scalar_lea.sflag [#allocation4], %s356_s12 }
 0x14e   : > { %p488_p5 = pnand %p914_p12, %p795_p6 }
 0x150   : > { %p489_p11 = pneg %p488_p5 }
 0x152   : > { %678 = dma.done.wait (%p489_p11), %s357_s17, 128  }
 0x153   : > { %680 = vsyncadd (%p489_p11), %s357_s17, 4294967168  ;;  %s915_s23 = sld [smem:[#allocation13_spill]]  ;;  %p20_p2 = scmp.ge.s32.totalorder %s765_s29, 4  }
 0x154   : > { %s916_s17 = sld [smem:[#allocation14_spill]]  ;;  %s917_s15 = smov %s687_s16 }
 0x155   : > { %s919_s18 = smov %s765_s29  ;;  %22 = sbr.rel (!%p20_p2) target bundleno = 9 (0x9), region = 98 }
 0x159   : > { %s918_s16 = smov %s915_s23 }
 0x15a   :  { %363 = vsyncpa [#allocation3], 1 }
 0x15b   :  { %365 = vsyncpa [#allocation3 + $0x1], 1 }
 0x15c   :  { %366 = vsyncpa [#allocation6], 1 }
 0x15d   :  { %368 = vsyncpa [#allocation6 + $0x1], 1 }
 0x15e   :  { %369 = vsyncpa [#allocation4], 1 }
 0x15f   :  { %371 = vsyncpa [#allocation4 + $0x1], 1 }

</bundles_post_ra>
